<compile_context>
chip_gen: v7x
topology: tpu7x:2x2x1
jax: 0.10.0
libtpu: 0.0.40
codegen_flags: <defaults>
</compile_context>

<pallas_src>
import functools

import jax
import jax.numpy as jnp
import numpy as np
from jax.experimental import pallas as pl
from jax.experimental.pallas import tpu as pltpu


def _round_up(v, m):
    return (v + m - 1) // m * m


def _pick_packing(h, w, r):
    """Choose g: each (H, W) plane is viewed as (H/g, g*W) (metadata-only).

    Constraints / preferences:
      * h % g == 0 and (h // g) % 8 == 0  -> channel<->row merge reshapes in
        the kernel stay sublane-aligned (layout-trivial).
      * r*r*g*w <= 512 caps the selector at <= 1 MiB and bounds MXU work.
      * Prefer the smallest g that makes the input lane-dense (g*W >= 128),
        otherwise the largest capped g (maximizes output lane width).
    Returns (g, merge_ok).  merge_ok=False -> process one channel per step.
    """
    aligned = [g for g in range(1, h + 1) if h % g == 0 and (h // g) % 8 == 0]
    if not aligned:
        return 1, False
    capped = [g for g in aligned if r * r * g * w <= 512] or [min(aligned)]
    dense = [g for g in capped if g * w >= 128]
    return (min(dense) if dense else max(capped)), True


def _pick_channel_block(c_out, r, hg, gw, n_lanes, itemsize, n_batch,
                        target_bytes=4 * 1024 * 1024):
    """Largest divisor of c_out whose PADDED (VMEM) in+out block fits within
    `target_bytes` (double-buffered total <= 2x that), keeping >= 2 grid steps
    overall when possible (v7x has 2 TensorCores)."""
    pad_in = r * r * _round_up(hg, 8) * _round_up(gw, 128) * itemsize
    pad_out = _round_up(hg, 8) * _round_up(n_lanes, 128) * itemsize
    cap = max(1, target_bytes // (pad_in + pad_out))
    if n_batch < 2 and c_out > 1:
        cap = min(cap, max(1, c_out // 2))
    blk = 1
    for d in range(1, c_out + 1):
        if c_out % d == 0 and d <= cap:
            blk = d
    return blk


def _build_selector(r, w, g):
    """One-hot selector S of shape (r*r*g*W, g*r*W*r) such that
    (lane-concatenated planes) @ S == pixel-shuffled packed rows.

    K index: k = p*(g*W) + h_lo*W + w   with p = i*r + j
    N index: n = h_lo*(r*W*r) + i*(W*r) + w*r + j
    Exact relayout (each row of S has exactly one 1)."""
    k_dim = r * r * g * w
    n_dim = g * r * w * r
    k = np.arange(k_dim)
    p, rem = np.divmod(k, g * w)
    h_lo, ww = np.divmod(rem, w)
    i, j = np.divmod(p, r)
    n = h_lo * (r * w * r) + i * (w * r) + ww * r + j
    s = np.zeros((k_dim, n_dim), dtype=np.float32)
    s[k, n] = 1.0
    return s


def _pixel_shuffle_kernel(x_ref, s_ref, o_ref, *, scale, c_blk, hg, gw):
    # x_ref: (1, c_blk*r*r, hg, gw)      s_ref: (r*r*gw, n_lanes)
    # o_ref: (1, c_blk, hg, n_lanes)     with n_lanes == r*r*gw
    r = scale
    rr = r * r
    x = x_ref[...].reshape(c_blk, rr, hg, gw)
    # Lane-concatenate the r*r sub-pixel planes of every channel.
    xk = jnp.concatenate([x[:, p, :, :] for p in range(rr)], axis=-1)
    # Batch channels into the matmul M dimension (sublane-aligned merge).
    xk = xk.reshape(c_blk * hg, rr * gw)
    if xk.dtype == jnp.bfloat16:
        # One-hot select is exact in a single default-precision MXU pass.
        y = jnp.dot(xk, s_ref[...], preferred_element_type=jnp.bfloat16)
    else:
        y = jnp.dot(xk, s_ref[...],
                    precision=jax.lax.Precision.HIGHEST,
                    preferred_element_type=jnp.float32)
    # Single full-width (lane-dense) block store; contributions are disjoint.
    o_ref[...] = y.reshape(1, c_blk, hg, y.shape[-1]).astype(o_ref.dtype)


def sub_pixel_forward(x, scale):
    """Forward pass of `sub_pixel` (PixelShuffle) as a Pallas TPU kernel."""
    n, c_in, h, w = x.shape
    r = int(scale)
    assert c_in % (r * r) == 0, "channels must be divisible by scale**2"
    # TODO(synk): integer dtypes would silently promote through the one-hot
    # matmul; restrict to f32 / bf16 (both exact here).
    assert x.dtype in (jnp.float32, jnp.bfloat16), "float32/bfloat16 only"
    c_out = c_in // (r * r)

    g, merge_ok = _pick_packing(h, w, r)
    hg, gw = h // g, g * w
    n_lanes = g * r * w * r

    if merge_ok:
        c_blk = _pick_channel_block(c_out, r, hg, gw, n_lanes,
                                    x.dtype.itemsize, n)
    else:
        c_blk = 1   # no aligned packing -> keep merges trivially layout-safe

    x_view = x.reshape(n, c_in, hg, gw)                      # metadata-only
    sel = jnp.asarray(_build_selector(r, w, g), dtype=x.dtype)

    kernel = functools.partial(_pixel_shuffle_kernel,
                               scale=r, c_blk=c_blk, hg=hg, gw=gw)

    out = pl.pallas_call(
        kernel,
        out_shape=jax.ShapeDtypeStruct((n, c_out, hg, n_lanes), x.dtype),
        grid_spec=pltpu.PrefetchScalarGridSpec(
            num_scalar_prefetch=0,
            grid=(n, c_out // c_blk),
            in_specs=[
                pl.BlockSpec((1, c_blk * r * r, hg, gw),
                             lambda ni, ci: (ni, ci, 0, 0)),
                pl.BlockSpec((r * r * gw, n_lanes),      # constant selector
                             lambda ni, ci: (0, 0)),
            ],
            out_specs=pl.BlockSpec((1, c_blk, hg, n_lanes),
                                   lambda ni, ci: (ni, ci, 0, 0)),
        ),
        compiler_params=pltpu.CompilerParams(
            dimension_semantics=("parallel", "parallel"),
            vmem_limit_bytes=32 * 1024 * 1024),
    )(x_view, sel)
    # (n, c_out, H/g, g*r*W*r) is contiguous-identical to (n, c_out, H*r, W*r);
    # this reshape is metadata-only.
    return out.reshape(n, c_out, h * r, w * r)


def _reference(x, scale):
    # Pure-JAX PixelShuffle reference (matches torch.nn.PixelShuffle on NCHW).
    n, c_in, h, w = x.shape
    r = scale
    c = c_in // (r * r)
    y = x.reshape(n, c, r, r, h, w)
    y = jnp.transpose(y, (0, 1, 4, 2, 5, 3))
    return y.reshape(n, c, h * r, w * r)


if __name__ == "__main__":
    scale = 2
    key = jax.random.PRNGKey(0)
    # (N, C*r*r, H, W) = (2, 16, 16, 16) -> out (2, 4, 32, 32)
    x = jax.random.normal(key, (2, 16, 16, 16), dtype=jnp.float32)

    out = jax.block_until_ready(sub_pixel_forward(x, scale))
    ref = _reference(x, scale)

    assert out.shape == (2, 4, 32, 32), out.shape
    if not np.allclose(np.asarray(out), np.asarray(ref), rtol=1e-5, atol=1e-5):
        raise AssertionError("Pallas pixel shuffle mismatch vs reference")
    print("KERNEL_OK")
</pallas_src>

<mosaic_0001>
module attributes {stable_mosaic.version = 11 : i64} {
  func.func @_pixel_shuffle_kernel(%arg0: i32, %arg1: i32, %arg2: memref<1x16x8x32xf32, #tpu.memory_space<vmem>>, %arg3: memref<128x128xf32, #tpu.memory_space<vmem>>, %arg4: memref<1x4x8x128xf32, #tpu.memory_space<vmem>>) attributes {dimension_semantics = [#tpu.dimension_semantics<parallel>, #tpu.dimension_semantics<parallel>], iteration_bounds = array<i64: 2, 1>, scalar_prefetch = 0 : i64, scratch_operands = 0 : i64, tpu.core_type = #tpu.core_type<tc>, window_params = [{transform_indices = @transform_0, window_bounds = array<i64: 1, 16, 8, 32>}, {pipeline_mode = #tpu.pipeline_mode<synchronous>, transform_indices = @transform_1, window_bounds = array<i64: 128, 128>}, {transform_indices = @transform_2, window_bounds = array<i64: 1, 4, 8, 128>}]} {
    %c0 = arith.constant 0 : index
    %c0_0 = arith.constant 0 : index
    %c0_1 = arith.constant 0 : index
    %c0_2 = arith.constant 0 : index
    %0 = vector.load %arg2[%c0, %c0_0, %c0_1, %c0_2] : memref<1x16x8x32xf32, #tpu.memory_space<vmem>>, vector<1x16x8x32xf32>
    %1 = vector.shape_cast %0 : vector<1x16x8x32xf32> to vector<4x4x8x32xf32>
    %2 = vector.extract_strided_slice %1 {offsets = [0, 0, 0, 0], sizes = [4, 1, 8, 32], strides = [1, 1, 1, 1]} : vector<4x4x8x32xf32> to vector<4x1x8x32xf32>
    %3 = vector.shape_cast %2 : vector<4x1x8x32xf32> to vector<4x8x32xf32>
    %4 = vector.extract_strided_slice %1 {offsets = [0, 1, 0, 0], sizes = [4, 1, 8, 32], strides = [1, 1, 1, 1]} : vector<4x4x8x32xf32> to vector<4x1x8x32xf32>
    %5 = vector.shape_cast %4 : vector<4x1x8x32xf32> to vector<4x8x32xf32>
    %6 = vector.extract_strided_slice %1 {offsets = [0, 2, 0, 0], sizes = [4, 1, 8, 32], strides = [1, 1, 1, 1]} : vector<4x4x8x32xf32> to vector<4x1x8x32xf32>
    %7 = vector.shape_cast %6 : vector<4x1x8x32xf32> to vector<4x8x32xf32>
    %8 = vector.extract_strided_slice %1 {offsets = [0, 3, 0, 0], sizes = [4, 1, 8, 32], strides = [1, 1, 1, 1]} : vector<4x4x8x32xf32> to vector<4x1x8x32xf32>
    %9 = vector.shape_cast %8 : vector<4x1x8x32xf32> to vector<4x8x32xf32>
    %10 = tpu.concatenate %3, %5, %7, %9 in 2 : vector<4x8x32xf32>, vector<4x8x32xf32>, vector<4x8x32xf32>, vector<4x8x32xf32> -> vector<4x8x128xf32>
    %11 = vector.shape_cast %10 : vector<4x8x128xf32> to vector<32x128xf32>
    %c0_3 = arith.constant 0 : index
    %c0_4 = arith.constant 0 : index
    %12 = vector.load %arg3[%c0_3, %c0_4] : memref<128x128xf32, #tpu.memory_space<vmem>>, vector<128x128xf32>
    %cst = arith.constant dense<0.000000e+00> : vector<32x128xf32>
    %13 = tpu.matmul %11, %12, %cst {dimension_numbers = #tpu.dot_dimension_numbers<[1], [0], [0], [1], [0, 0, 1, 1], [], []>, precision = #tpu.contract_precision<fp32>} : vector<32x128xf32>, vector<128x128xf32>, vector<32x128xf32> -> vector<32x128xf32>
    %14 = vector.shape_cast %13 : vector<32x128xf32> to vector<1x4x8x128xf32>
    %c0_5 = arith.constant 0 : index
    %c0_6 = arith.constant 0 : index
    %c0_7 = arith.constant 0 : index
    %c0_8 = arith.constant 0 : index
    %15 = vector.load %arg4[%c0_5, %c0_6, %c0_7, %c0_8] : memref<1x4x8x128xf32, #tpu.memory_space<vmem>>, vector<1x4x8x128xf32>
    tpu.vector_store %arg4[%c0_5, %c0_6, %c0_7, %c0_8], %14 {strides = array<i32>} : memref<1x4x8x128xf32, #tpu.memory_space<vmem>>, vector<1x4x8x128xf32>,
    return
  }
  func.func @transform_0(%arg0: i32, %arg1: i32) -> (i32, i32, i32, i32) {
    %c0_i32 = arith.constant 0 : i32
    %c0_i32_0 = arith.constant 0 : i32
    %c0_i32_1 = arith.constant 0 : i32
    return %arg0, %arg1, %c0_i32, %c0_i32_0 : i32, i32, i32, i32
  }
  func.func @transform_1(%arg0: i32, %arg1: i32) -> (i32, i32) {
    %c0_i32 = arith.constant 0 : i32
    %c0_i32_0 = arith.constant 0 : i32
    %c0_i32_1 = arith.constant 0 : i32
    return %c0_i32, %c0_i32_0 : i32, i32
  }
  func.func @transform_2(%arg0: i32, %arg1: i32) -> (i32, i32, i32, i32) {
    %c0_i32 = arith.constant 0 : i32
    %c0_i32_0 = arith.constant 0 : i32
    %c0_i32_1 = arith.constant 0 : i32
    return %arg0, %arg1, %c0_i32, %c0_i32_0 : i32, i32, i32, i32
  }
}

</mosaic_0001>

<bundles_post_ra>
// kernel: tpu_custom_call.1
= control target key start
LH: loop header
LB: loop body
LE: loop exit
PB: predicated region body
PF: predicated region fallthrough
CT: control target
= control target key end

     0   :  { %7 = vsyncpa [#allocation3], 0  ;;  %s2608_s0 = inlined_call_operand.hbm [shape: f32[2,16,8,32], index: 0, kind: input, shape index: {}]   ;;  %s2609_s1 = inlined_call_operand.hbm [shape: f32[128,128], index: 1, kind: input, shape index: {}]   ;;  %s2610_s2 = inlined_call_operand.hbm [shape: f32[2,4,8,128], index: 2, kind: output, shape index: {}]  }
   0x1   :  { %9 = vsyncpa [#allocation3 + $0x1], 0 }
   0x2   :  { %10 = vsyncpa [#allocation6], 0 }
   0x3   :  { %11 = vsyncpa [#allocation4], 0 }
   0x4   :  { %13 = vsyncpa [#allocation4 + $0x1], 0  ;;  %s2009_s9 = smov 0   ;;  %s2011_s10 = smov 0  }
   0x5   :  { %s2013_s11 = smov 0   ;;  %s2015_s12 = smov 0  }
   0x6   :  { %s2017_s13 = smov 0   ;;  %s2019_s14 = smov 0  }
   0x7 LB: > { %s1179_s15 = sadd.s32 4294967295, %s1982_s14   ;;  %s1180_s16 = sadd.s32 4294967294, %s1982_s14   ;;  %s1982_s14 = sphi %s2019_s14, %s19_s14   ;;  %s1978_s13 = sphi %s2017_s13, %s2634_s13   ;;  %s1974_s12 = sphi %s2015_s12, %s2633_s12   ;;  %s1970_s11 = sphi %s2013_s11, %s2632_s11   ;;  %s1966_s10 = sphi %s2011_s10, %s2631_s10   ;;  %s1962_s9 = sphi %s2009_s9, %s2630_s9  }
   0x8   : > { %p53_p0 = scmp.ne.s32.totalorder %s1966_s10, %s1962_s9  ;;  %p2043_p1 = scmp.eq.s32.totalorder %s1179_s15, 0 }
   0x9   : > { %p2047_p2 = scmp.eq.s32.totalorder %s1179_s15, 1  ;;  %p106_p3 = scmp.eq.s32.totalorder %s1180_s16, 1 }
   0xa   : > { %s2615_s17 = scalar_select %p2043_p1, 1, 0 }
   0xb   : > { %s2616_s18 = scalar_select %p2047_p2, 1, 0 }
   0xc   : > { %p2053_p4 = por %p2043_p1, %p53_p0  ;;  %p1181_p5 = scmp.ge.s32.totalorder %s1982_s14, 1 }
   0xd   : > { %p2058_p6 = por %p106_p3, %p53_p0  ;;  %p113_p7 = scmp.lt.s32.totalorder %s1982_s14, 3 }
   0xe   : > { %s2617_s19 = scalar_select %p2053_p4, 1, 0 }
   0xf   : > { %s2618_s20 = scalar_select %p2058_p6, 1, 0 }
  0x10   : > { %p2063_p8 = pnand %p1181_p5, %p113_p7  ;;  %s1984_s22 = smov [#allocation5]  }
  0x11   : > { %s125_s23 = sshll.u32 %s1984_s22, 4  ;;  %s31_s25 = sadd.s32 1, %s1978_s13  ;;  %s126_s23 = int_to_ptr.vmem [resolvable:$true] %s125_s23 }
  0x12   : > { %s2619_s21 = scalar_select %p2063_p8, 1, 0 }
  0x13   : > { %p1766_p9 = pneg %p2063_p8  ;;  %s1838_s28 = scalar_lea.hbm %s2609_s1, 2048 }
  0x14   : > { %p1839_p12 = scmp.ne.s32.totalorder %s2609_s1, %s1838_s28  ;;  %p1845_p5 = scmp.lt.u32.totalorder %s1838_s28, %s2609_s1 }
  0x15   : > { %p2072_p11 = pnand %p1766_p9, %p2043_p1 }
  0x17   : > { %p1840_p13 = pneg %p2072_p11 }
  0x19   : > { %p1841_p0 = pnand %p1840_p13, %p1839_p12 }
  0x1b   : > { %p1842_p3 = pneg %p1841_p0 }
  0x1d   : > { %p1847_p7 = pnand %p1845_p5, %p1842_p3 }
  0x1f   : > { %1850 = shalt.err (!%p1847_p7)
}
  0x20   : > { %s1851_s5 = scalar_lea.vmem %s126_s23, 2048  ;;  %p1859_p1 = scmp.lt.s32.totalorder %s126_s23, %s126_s23 }
  0x21   : > { %p1852_p9 = scmp.ne.s32.totalorder %s126_s23, %s1851_s5  ;;  %p1860_p4 = scmp.lt.s32.totalorder %s1851_s5, %s1851_s5 }
  0x23   : > { %p1854_p10 = pnand %p1852_p9, %p1840_p13  ;;  %p1861_p8 = por %p1860_p4, %p1859_p1 }
  0x25   : > { %p1855_p6 = pneg %p1854_p10 }
  0x27   : > { %p1862_p2 = pnand %p1861_p8, %p1855_p6 }
  0x29   : > { %1865 = shalt.err (!%p1862_p2)
}
  0x2a   : > { %s1985_s6 = smov 128   ;;  %s1986_s7 = smov 8  }
  0x2b   : > { %1769 = dma.hbm_to_vmem [thread:$0]  (!%p2072_p11), %s2609_s1, 2048, %s126_s23, [#allocation6], %s1985_s6, %s1985_s6, %s1986_s7  }
  0x2c   : > { %p33_p1 = scmp.ge.s32.totalorder %s31_s25, 2  ;;  %s40_s16 = sadd.s32 1, %s1970_s11 }
  0x2d   : > { %p47_p2 = scmp.ne.s32.totalorder %s1970_s11, %s1966_s10  ;;  %p48_p4 = scmp.eq.s32.totalorder %s1982_s14, 0 }
  0x2e   : > { %s2636_s25 = smov (%p33_p1, %s31_s25), 0  ;;  %p2622_p8 = scmp.ne.s32.totalorder %s2616_s18, 0 }
  0x2f   : > { %p2102_p6 = por %p48_p4, %p47_p2  ;;  %s35_s26 = ssub.s32 %s1978_s13, %s2636_s25 }
  0x30   : > { %p2108_p10 = por %p2622_p8, %p47_p2  ;;  %p1779_p12 = scmp.lt.s32.totalorder %s1982_s14, 2 }
  0x31   : > { %p38_p11 = scmp.eq.s32.totalorder %s35_s26, 0  ;;  %s139_s23 = sand.u32 1, %s1970_s11  }
  0x32   : > { %s1184_s27 = sshll.u32 %s139_s23, 7  ;;  %s1196_s29 = sshll.u32 %s1978_s13, 11 }
  0x33   : > { %s2117_s28 = scalar_select %p38_p11, %s1970_s11, %s40_s16  }
  0x34   : > { %s2123_s4 = scalar_lea.hbm %s2608_s0, %s1196_s29  ;;  %s143_s18 = scalar_lea.vmem [#allocation2], %s1184_s27 }
  0x35   : > { %s152_s5 = sshll.u32 %s143_s18, 4  ;;  %p2129_p13 = pnand %p1779_p12, %p2102_p6  ;;  %s2125_s5 = int_to_ptr.vmem [resolvable:$true] %s152_s5 }
  0x36   : > { %s2133_s15 = scalar_lea.sflag [#allocation3], %s139_s23  ;;  %s1866_s16 = scalar_lea.hbm %s2123_s4, 2048 }
  0x37   : > { %p1867_p0 = scmp.ne.s32.totalorder %s2123_s4, %s1866_s16  ;;  %p1868_p3 = pneg %p2129_p13 }
  0x38   : > { %s1871_s22 = scalar_lea.hbm %s2608_s0, 4096  ;;  %p1872_p9 = scmp.lt.u32.totalorder %s2123_s4, %s2608_s0 }
  0x39   : > { %p1869_p5 = pnand %p1868_p3, %p1867_p0  ;;  %p1873_p1 = scmp.lt.u32.totalorder %s1871_s22, %s1866_s16 }
  0x3a   : > { %p1875_p4 = scmp.lt.u32.totalorder %s1866_s16, %s2123_s4 }
  0x3b   : > { %p1870_p7 = pneg %p1869_p5  ;;  %p1874_p2 = por %p1873_p1, %p1872_p9 }
  0x3d   : > { %p1876_p6 = por %p1875_p4, %p1874_p2 }
  0x3f   : > { %p1877_p8 = pnand %p1876_p6, %p1870_p7 }
  0x41   : > { %1880 = shalt.err (!%p1877_p8)
}
  0x42   : > { %s1881_s23 = scalar_lea.vmem %s2125_s5, 2048  ;;  %s1987_s3 = smov [#allocation2]  }
  0x43   : > { %p1882_p12 = scmp.ne.s32.totalorder %s2125_s5, %s1881_s23  ;;  %s1886_s18 = sshll.u32 %s1987_s3, 4  ;;  %s1887_s18 = int_to_ptr.vmem [resolvable:$false] %s1886_s18 }
  0x44   : > { %s1888_s26 = scalar_lea.vmem %s1887_s18, 4096  ;;  %p1889_p5 = scmp.lt.s32.totalorder %s2125_s5, %s1887_s18 }
  0x45   : > { %p1884_p11 = pnand %p1882_p12, %p1868_p3  ;;  %p1890_p9 = scmp.lt.s32.totalorder %s1888_s26, %s1881_s23 }
  0x47   : > { %p1885_p0 = pneg %p1884_p11  ;;  %p1891_p1 = por %p1890_p9, %p1889_p5 }
  0x49   : > { %p1892_p2 = pnand %p1891_p1, %p1885_p0 }
  0x4b   : > { %1895 = shalt.err (!%p1892_p2)
}
  0x4c   : > { %1773 = dma.hbm_to_vmem [thread:$0]  (!%p2129_p13), %s2123_s4, 2048, %s2125_s5, %s2133_s15, %s1985_s6, %s1985_s6, %s1986_s7  }
  0x4d   : > { %p2625_p3 = scmp.ne.s32.totalorder %s2619_s21, 0 }
  0x4e   : > { %s2167_s16 = sand.u32 (!%p2625_p3), 1, %s1966_s10   ;;  %p2626_p7 = scmp.ne.s32.totalorder (!%p2625_p3), %s2617_s19, 0 }
  0x4f   : > { %164 = sbr.rel (%p2625_p3) target bundleno = 524 (0x20c), region = 28  ;;  %s1188_s27 = sshll.u32 (!%p2625_p3), %s2167_s16, 7 }
  0x50   : > { %s167_s22 = scalar_lea.sflag (!%p2625_p3), [#allocation3], %s2167_s16  ;;  %s2171_s29 = scalar_lea.vmem (!%p2625_p3), [#allocation2], %s1188_s27 }
  0x56   : > { %1949 = dma.done.wait (%p2626_p7), %s167_s22, 2048  }
  0x57   : > { %1951 = vsyncadd (%p2626_p7), %s167_s22, 4294965248  ;;  %p2627_p13 = scmp.ne.s32.totalorder %s2615_s17, 0 }
  0x59   : > { %1953 = dma.done.wait (%p2627_p13), [#allocation6], 2048  }
  0x5a   : > { %1955 = vsyncadd (%p2627_p13), [#allocation6], 4294965248  ;;  %v199_v0 = vld [vmem:[%s2171_s29 + $0x10] sm:$0xff]  ;;  %v198_v1 = vld [vmem:[%s2171_s29 + $0x8] sm:$0xff]  ;;  %s1988_s21 = smov 64   ;;  %s1989_s6 = smov 32  }
  0x5b   : > { %233 = vrot.lane.b32.xlu1 %v199_v0, %s1988_s21  ;;  %217 = vrot.lane.b32.xlu0 %v198_v1, %s1989_s6  ;;  %v276_v2 = vld [vmem:[#allocation5] sm:$0xff]  ;;  %v203_v3 = vld [vmem:[%s2171_s29 + $0x30] sm:$0xff]  ;;  %v202_v4 = vld [vmem:[%s2171_s29 + $0x28] sm:$0xff]  ;;  %s1990_s17 = smov 96   ;;  %vm261_vm0 = vcmask 261120   ;;  %vm266_vm1 = vcmask 523264  }
  0x5c   : > { %v293_v5 = vand.u32 4294901760, %v276_v2  ;;  %v204_v6 = vld [vmem:[%s2171_s29 + $0x38] sm:$0xff]  ;;  %v277_v8 = vld [vmem:[#allocation5 + $0x8] sm:$0xff]  ;;  %v278_v9 = vld [vmem:[#allocation5 + $0x10] sm:$0xff]  ;;  %vm271_vm2 = vcmask 785408   ;;  %s1190_s19 = sshll.u32 %s2167_s16, 5 }
  0x5d   : > { %v200_v7 = vld [vmem:[%s2171_s29 + $0x18] sm:$0xff]  ;;  %v296_v10 = vand.u32 4294901760, %v277_v8  ;;  %v299_v12 = vand.u32 4294901760, %v278_v9  ;;  %v280_v13 = vld [vmem:[#allocation5 + $0x20] sm:$0xff]  ;;  %v281_v14 = vld [vmem:[#allocation5 + $0x28] sm:$0xff]  ;;  %s194_s7 = scalar_lea.vmem [#allocation7], %s1190_s19 }
  0x5e   : > { %v279_v11 = vld [vmem:[#allocation5 + $0x18] sm:$0xff]  ;;  %v2191_v15 = vsub.f32 %v276_v2, %v293_v5  ;;  %v305_v17 = vand.u32 4294901760, %v280_v13  ;;  %v308_v18 = vand.u32 4294901760, %v281_v14  ;;  %v282_v19 = vld [vmem:[#allocation5 + $0x30] sm:$0xff]  ;;  %v2193_v21 = vld [vmem:[#allocation5 + $0x40] sm:$0xff]  ;;  %s1082_s4 = sshll.u32 %s194_s7, 4  ;;  %s2554_s4 = int_to_ptr.vmem [resolvable:$true] %s1082_s4 }
  0x5f   : > { %235 = vrot.lane.b32.xlu1 %v203_v3, %s1988_s21  ;;  %219 = vrot.lane.b32.xlu0 %v202_v4, %s1989_s6  ;;  %v302_v16 = vand.u32 4294901760, %v279_v11  ;;  %v283_v20 = vld [vmem:[#allocation5 + $0x38] sm:$0xff]  ;;  %v2195_v22 = vpack.c.bf16 %v296_v10, %v293_v5  ;;  %v311_v23 = vand.u32 4294901760, %v282_v19  ;;  %v2197_v25 = vld [vmem:[#allocation5 + $0x48] sm:$0xff]  ;;  %v2199_v26 = vld [vmem:[#allocation5 + $0x50] sm:$0xff]  ;;  %v317_v28 = vand.u32 4294901760, %v2193_v21 }
  0x60   : > { %v314_v24 = vand.u32 4294901760, %v283_v20  ;;  %v320_v29 = vand.u32 4294901760, %v2197_v25  ;;  %v2205_v30 = vld [vmem:[#allocation5 + $0x58] sm:$0xff]  ;;  %v323_v31 = vand.u32 4294901760, %v2199_v26  ;;  %v2208_v32 = vld [vmem:[#allocation5 + $0x60] sm:$0xff]  ;;  %v2213_v34 = vld [vmem:[#allocation5 + $0x68] sm:$0xff]  ;;  %v2220_v38 = vpack.c.bf16 %v308_v18, %v305_v17 }
  0x61   : > { %v2201_v27 = vpack.c.bf16 %v302_v16, %v299_v12  ;;  %v326_v33 = vand.u32 4294901760, %v2205_v30  ;;  %v416_v35 = vand.u32 4294901760, %v2191_v15  ;;  %v206_v36 = vld [vmem:[%s2171_s29 + $0x48] sm:$0xff]  ;;  %1643 = vmatprep.subr.bf16.mxu0 %v2195_v22  ;;  %1547 = vmatprep.subr.bf16.mxu1 %v2195_v22  ;;  %v329_v40 = vand.u32 4294901760, %v2208_v32  ;;  %v207_v49 = vld [vmem:[%s2171_s29 + $0x50] sm:$0xff]  ;;  %v208_v4 = vld [vmem:[%s2171_s29 + $0x58] sm:$0xff] }
  0x62   : > { %v210_v37 = vld [vmem:[%s2171_s29 + $0x68] sm:$0xff]  ;;  %1645 = vmatpush3.bf16.msra.mxu0 %v2195_v22  ;;  %1549 = vmatpush3.bf16.msra.mxu1 %v2195_v22  ;;  %v2224_v39 = vpack.c.bf16 %v314_v24, %v311_v23  ;;  %v332_v41 = vand.u32 4294901760, %v2213_v34  ;;  %v2228_v42 = vsub.f32 %v277_v8, %v296_v10  ;;  %v2236_v43 = vpack.c.bf16 %v320_v29, %v317_v28  ;;  %v211_v50 = vld [vmem:[%s2171_s29 + $0x70] sm:$0xff]  ;;  %v212_v5 = vld [vmem:[%s2171_s29 + $0x78] sm:$0xff]  ;;  %s1197_s5 = sshll.u32 %s1974_s12, 9  ;;  %s1067_s23 = scalar_lea.sflag [#allocation4], %s2167_s16 }
  0x63   : > { %251 = vrot.lane.b32.xlu1 %v204_v6, %s1990_s17  ;;  %249 = vrot.lane.b32.xlu0 %v200_v7, %s1990_s17  ;;  %v2242_v44 = vpack.c.bf16 %v326_v33, %v323_v31  ;;  %v2244_v45 = vsub.f32 %v278_v9, %v299_v12  ;;  %v2251_v46 = vsub.f32 %v2191_v15, %v416_v35  ;;  %v2259_v51 = vld [vmem:[#allocation5 + $0x70] sm:$0xff]  ;;  %s2559_s30 = scalar_lea.hbm %s2610_s2, %s1197_s5  ;;  %s1896_s12 = scalar_lea.vmem %s2554_s4, 512 }
  0x64   : > { %1647 = vmatprep.subr.bf16.mxu0 %v2201_v27  ;;  %1551 = vmatprep.subr.bf16.mxu1 %v2201_v27  ;;  %v2253_v47 = vsub.f32 %v279_v11, %v302_v16  ;;  %v2255_v48 = vsub.f32 %v280_v13, %v305_v17  ;;  %v2262_v53 = vsub.f32 %v281_v14, %v308_v18  ;;  %v423_v57 = vand.u32 4294901760, %v2228_v42  ;;  %p1897_p4 = scmp.ne.s32.totalorder %s2554_s4, %s1896_s12  ;;  %s1991_s3 = smov [#allocation7]  }
  0x65   : > { %v430_v52 = vand.u32 4294901760, %v2244_v45  ;;  %v2264_v54 = vsub.f32 %v282_v19, %v311_v23  ;;  %v2266_v55 = vsub.f32 %v283_v20, %v314_v24  ;;  %v2274_v56 = vpack.c.bf16 %v332_v41, %v329_v40  ;;  %v291_v19 = vld [vmem:[#allocation5 + $0x78] sm:$0xff]  ;;  %s1900_s18 = sshll.u32 %s1991_s3, 4  ;;  %s1901_s18 = int_to_ptr.vmem [resolvable:$false] %s1900_s18 }
  0x66   : > { %1649 = vmatpush3.bf16.msra.mxu0 %v2201_v27  ;;  %1553 = vmatpush3.bf16.msra.mxu1 %v2201_v27  ;;  %v437_v58 = vand.u32 4294901760, %v2253_v47  ;;  %v444_v59 = vand.u32 4294901760, %v2255_v48  ;;  %v451_v61 = vand.u32 4294901760, %v2262_v53  ;;  %v335_v0 = vand.u32 4294901760, %v2259_v51  ;;  %p1898_p6 = pnand %p1897_p4, %p2108_p10  ;;  %s1902_s26 = scalar_lea.vmem %s1901_s18, 1024 }
  0x67   : > { %221 = vrot.lane.b32.xlu0 %v206_v36, %s1989_s6  ;;  %223 = vrot.lane.b32.xlu1 %v210_v37, %s1989_s6  ;;  %v431_v60 = vsub.f32 %v2244_v45, %v430_v52  ;;  %v458_v62 = vand.u32 4294901760, %v2264_v54  ;;  %v465_v63 = vand.u32 4294901760, %v2266_v55  ;;  %v2304_v10 = vsub.f32 %v2228_v42, %v423_v57  ;;  %p1903_p12 = scmp.lt.s32.totalorder %s2554_s4, %s1901_s18  ;;  %p1904_p11 = scmp.lt.s32.totalorder %s1902_s26, %s1896_s12 }
  0x68   : > { %1651 = vmatprep.subr.bf16.mxu0 %v2220_v38  ;;  %1555 = vmatprep.subr.bf16.mxu1 %v2220_v38  ;;  %v2288_v1 = vpack.c.bf16 %v437_v58, %v430_v52  ;;  %v438_v2 = vsub.f32 %v2253_v47, %v437_v58  ;;  %v445_v3 = vsub.f32 %v2255_v48, %v444_v59  ;;  %p1899_p8 = pneg %p1898_p6 }
  0x69   : > { %v432_v6 = vand.u32 4294901760, %v431_v60  ;;  %v2294_v7 = vpack.c.bf16 %v451_v61, %v444_v59  ;;  %v452_v8 = vsub.f32 %v2262_v53, %v451_v61  ;;  %v2297_v9 = vpack.c.bf16 %v465_v63, %v458_v62  ;;  %p1905_p0 = por %p1904_p11, %p1903_p12 }
  0x6a   : > { %1653 = vmatpush3.bf16.msra.mxu0 %v2220_v38  ;;  %1557 = vmatpush3.bf16.msra.mxu1 %v2220_v38  ;;  %v439_v11 = vand.u32 4294901760, %v438_v2  ;;  %v446_v12 = vand.u32 4294901760, %v445_v3  ;;  %v459_v13 = vsub.f32 %v2264_v54, %v458_v62  ;;  %v466_v16 = vsub.f32 %v2266_v55, %v465_v63 }
  0x6b   : > { %237 = vrot.lane.b32.xlu0 %v207_v49, %s1988_s21  ;;  %239 = vrot.lane.b32.xlu1 %v211_v50, %s1988_s21  ;;  %v453_v14 = vand.u32 4294901760, %v452_v8  ;;  %v2313_v17 = vsub.f32 %v2193_v21, %v317_v28  ;;  %v2318_v18 = vsub.f32 %v2197_v25, %v320_v29  ;;  %v2327_v24 = vsub.f32 %v2199_v26, %v323_v31  ;;  %p1906_p5 = pnand %p1905_p0, %p1899_p8 }
  0x6c   : > { %1655 = vmatprep.subr.bf16.mxu0 %v2224_v39  ;;  %1559 = vmatprep.subr.bf16.mxu1 %v2224_v39  ;;  %v2322_v20 = vpack.c.bf16 %v439_v11, %v432_v6  ;;  %v460_v23 = vand.u32 4294901760, %v459_v13  ;;  %v2332_v21 = vsub.f32 %v2205_v30, %v326_v33  ;;  %v467_v28 = vand.u32 4294901760, %v466_v16 }
  0x6d   : > { %v2334_v25 = vpack.c.bf16 %v453_v14, %v446_v12  ;;  %v472_v29 = vand.u32 4294901760, %v2313_v17  ;;  %v479_v36 = vand.u32 4294901760, %v2318_v18  ;;  %v486_v37 = vand.u32 4294901760, %v2327_v24 }
  0x6e   : > { %1657 = vmatpush3.bf16.msra.mxu0 %v2224_v39  ;;  %1561 = vmatpush3.bf16.msra.mxu1 %v2224_v39  ;;  %v493_v26 = vand.u32 4294901760, %v2332_v21  ;;  %v2345_v30 = vsub.f32 %v2208_v32, %v329_v40  ;;  %v506_v31 = vsub.f32 %v2213_v34, %v332_v41  ;;  %v338_v33 = vand.u32 4294901760, %v291_v19 }
  0x6f   : > { %253 = vrot.lane.b32.xlu0 %v208_v4, %s1990_s17  ;;  %255 = vrot.lane.b32.xlu1 %v212_v5, %s1990_s17  ;;  %v2352_v49 = vpack.c.bf16 %v467_v28, %v460_v23  ;;  %v2354_v50 = vpack.c.bf16 %v479_v36, %v472_v29  ;;  %v473_v52 = vsub.f32 %v2313_v17, %v472_v29 }
  0x70   : > { %1659 = vmatprep.subr.bf16.mxu0 %v2236_v43  ;;  %1563 = vmatprep.subr.bf16.mxu1 %v2236_v43  ;;  %v480_v58 = vsub.f32 %v2318_v18, %v479_v36  ;;  %v2358_v59 = vpack.c.bf16 %v493_v26, %v486_v37  ;;  %v487_v32 = vsub.f32 %v2327_v24, %v486_v37  ;;  %v500_v41 = vand.u32 4294901760, %v2345_v30 }
  0x71   : > { %v494_v40 = vsub.f32 %v2332_v21, %v493_v26  ;;  %v474_v34 = vand.u32 4294901760, %v473_v52  ;;  %v507_v60 = vand.u32 4294901760, %v506_v31  ;;  %v513_v61 = vsub.f32 %v2259_v51, %v335_v0 }
  0x72   : > { %1661 = vmatpush3.bf16.msra.mxu0 %v2236_v43  ;;  %1565 = vmatpush3.bf16.msra.mxu1 %v2236_v43  ;;  %v481_v62 = vand.u32 4294901760, %v480_v58  ;;  %v488_v63 = vand.u32 4294901760, %v487_v32  ;;  %v520_v3 = vsub.f32 %v291_v19, %v338_v33  ;;  %v501_v5 = vsub.f32 %v2345_v30, %v500_v41 }
  0x73   : > { %v495_v2 = vand.u32 4294901760, %v494_v40  ;;  %1663 = vmatprep.subr.bf16.mxu0 %v2242_v44  ;;  %1567 = vmatprep.subr.bf16.mxu1 %v2242_v44  ;;  %v2370_v4 = vpack.c.bf16 %v507_v60, %v500_v41  ;;  %v508_v6 = vsub.f32 %v506_v31, %v507_v60  ;;  %v514_v8 = vand.u32 4294901760, %v513_v61  ;;  %v201_v40 = vld [vmem:[%s2171_s29 + $0x20] sm:$0xff] }
  0x74   : > { %v2373_v11 = vpack.c.bf16 %v481_v62, %v474_v34  ;;  %v521_v13 = vand.u32 4294901760, %v520_v3  ;;  %v502_v14 = vand.u32 4294901760, %v501_v5  ;;  %v2381_v19 = vpack.c.bf16 %v338_v33, %v335_v0  ;;  %v209_v5 = vld [vmem:[%s2171_s29 + $0x60] sm:$0xff] }
  0x75   : > { %v2375_v12 = vpack.c.bf16 %v495_v2, %v488_v63  ;;  %v509_v16 = vand.u32 4294901760, %v508_v6  ;;  %v515_v23 = vsub.f32 %v513_v61, %v514_v8  ;;  %v418_v36 = vand.u32 4294901760, %v2251_v46  ;;  %v205_v2 = vld [vmem:[%s2171_s29 + $0x40] sm:$0xff] }
  0x76   : > { %1665 = vmatpush3.bf16.msra.mxu0 %v2242_v44  ;;  %1569 = vmatpush3.bf16.msra.mxu1 %v2242_v44  ;;  %v2383_v28 = vpack.c.bf16 %v521_v13, %v514_v8  ;;  %v522_v29 = vsub.f32 %v520_v3, %v521_v13  ;;  %v425_v37 = vand.u32 4294901760, %v2304_v10  ;;  %v1674_v46 = vpack.c.bf16 %v423_v57, %v416_v35 }
  0x77   : > { %1667 = vmatprep.subr.bf16.mxu0 %v2274_v56  ;;  %1571 = vmatprep.subr.bf16.mxu1 %v2274_v56  ;;  %v2389_v26 = vpack.c.bf16 %v509_v16, %v502_v14  ;;  %v516_v52 = vand.u32 4294901760, %v515_v23  ;;  %v2405_v10 = vpack.c.bf16 %v2228_v42, %v2191_v15  ;;  %v2409_v33 = vpack.c.bf16 %v2253_v47, %v2244_v45 }
  0x78   : > { %v523_v58 = vand.u32 4294901760, %v522_v29  ;;  %v1578_v0 = vpack.c.bf16 %v425_v37, %v418_v36  ;;  %v2413_v35 = vpack.c.bf16 %v2262_v53, %v2255_v48  ;;  %v2417_v57 = vpack.c.bf16 %v2266_v55, %v2264_v54  ;;  %v197_v53 = vld [vmem:[%s2171_s29] sm:$0xff] }
  0x79   : > { %v2421_v32 = vpack.c.bf16 %v2318_v18, %v2313_v17  ;;  %v2425_v15 = vpack.c.bf16 %v2332_v21, %v2327_v24  ;;  %v2428_v42 = vpack.c.bf16 %v506_v31, %v2345_v30  ;;  %v2430_v45 = vpack.c.bf16 %v520_v3, %v513_v61 }
  0x7a   : > { %1669 = vmatpush3.bf16.msra.mxu0 %v2274_v56  ;;  %1573 = vmatpush3.bf16.msra.mxu1 %v2274_v56  ;;  %v2393_v51 = vpack.c.bf16 %v523_v58, %v516_v52 }
  0x7b   : > { %1671 = vmatprep.subr.bf16.mxu0 %v2381_v19  ;;  %1575 = vmatprep.subr.bf16.mxu1 %v2381_v19 }
  0x7e   : > { %1673 = vmatpush3.bf16.msra.mxu0 %v2381_v19  ;;  %1577 = vmatpush3.bf16.msra.mxu1 %v2381_v19 }
  0x7f   : > { %1675 = vmatprep.subr.bf16.mxu0 %v1674_v46  ;;  %1579 = vmatprep.subr.bf16.mxu1 %v1578_v0 }
  0xcd   : > { %v234_v47 = vpop.permute.xlu1 %233  ;;  %v218_v48 = vpop.permute.xlu0 %217 }
  0xce   : > { %v262_v17 = vsel %vm261_vm0, %v197_v53, %v218_v48 }
  0xcf   : > { %v267_v31 = vsel %vm266_vm1, %v262_v17, %v234_v47 }
  0xd1   : > { %v236_v54 = vpop.permute.xlu1 %235  ;;  %v220_v55 = vpop.permute.xlu0 %219 }
  0xd2   : > { %v263_v18 = vsel %vm261_vm0, %v201_v40, %v220_v55 }
  0xd3   : > { %v268_v21 = vsel %vm266_vm1, %v263_v18, %v236_v54 }
  0xd5   : > { %v252_v24 = vpop.permute.xlu1 %251  ;;  %v250_v30 = vpop.permute.xlu0 %249 }
  0xd6   : > { %v273_v34 = vsel %vm271_vm2, %v268_v21, %v252_v24  ;;  %v272_v41 = vsel %vm271_vm2, %v267_v31, %v250_v30 }
  0xd7   : > { %v2440_v60 = vand.u32 4294901760, %v273_v34  ;;  %v2442_v61 = vand.u32 4294901760, %v272_v41 }
  0xd9   : > { %v2445_v62 = vsub.f32 %v273_v34, %v2440_v60  ;;  %v2448_v63 = vsub.f32 %v272_v41, %v2442_v61  ;;  %v222_v3 = vpop.permute.xlu0 %221  ;;  %v224_v6 = vpop.permute.xlu1 %223 }
  0xda   : > { %v264_v14 = vsel %vm261_vm0, %v205_v2, %v222_v3  ;;  %v265_v16 = vsel %vm261_vm0, %v209_v5, %v224_v6 }
  0xdb   : > { %v375_v8 = vand.u32 4294901760, %v2448_v63  ;;  %v385_v13 = vand.u32 4294901760, %v2445_v62 }
  0xdd   : > { %v238_v23 = vpop.permute.xlu0 %237  ;;  %1464 = vmatprep.mubr.f32.mxu0 %v375_v8  ;;  %v240_v29 = vpop.permute.xlu1 %239  ;;  %v376_v36 = vsub.f32 %v2448_v63, %v375_v8  ;;  %v386_v37 = vsub.f32 %v2445_v62, %v385_v13 }
  0xde   : > { %1465 = vmatmul.mubr.f32.vlgmr.msra.gmra.mrb[0].mxu0 %v385_v13  ;;  %v269_v52 = vsel %vm266_vm1, %v264_v14, %v238_v23  ;;  %v270_v58 = vsel %vm266_vm1, %v265_v16, %v240_v29 }
  0xdf   : > { %1677 = vmatpush3.bf16.msra.mxu0 %v1674_v46  ;;  %v377_v47 = vand.u32 4294901760, %v376_v36  ;;  %v387_v48 = vand.u32 4294901760, %v386_v37 }
  0xe0   : > { %1679 = vmatprep.subr.bf16.mxu0 %v2288_v1 }
  0xe1   : > { %v254_v53 = vpop.permute.xlu0 %253  ;;  %1350 = vmatprep.mubr.f32.mxu1 %v377_v47  ;;  %v256_v40 = vpop.permute.xlu1 %255 }
  0xe2   : > { %v274_v54 = vsel %vm271_vm2, %v269_v52, %v254_v53  ;;  %v275_v55 = vsel %vm271_vm2, %v270_v58, %v256_v40  ;;  %1351 = vmatmul.mubr.f32.vlgmr.msra.gmra.mrb[0].mxu1 %v387_v48 }
  0xe3   : > { %v2463_v17 = vand.u32 4294901760, %v274_v54  ;;  %v2465_v18 = vand.u32 4294901760, %v275_v55  ;;  %1581 = vmatpush3.bf16.msra.mxu1 %v1578_v0  ;;  %1681 = vmatpush3.bf16.msra.mxu0 %v2288_v1 }
  0xe4   : > { %1583 = vmatprep.subr.bf16.mxu1 %v2322_v20  ;;  %1683 = vmatprep.subr.bf16.mxu0 %v2294_v7 }
  0xe5   : > { %v2471_v46 = vsub.f32 %v274_v54, %v2463_v17  ;;  %v2474_v24 = vsub.f32 %v275_v55, %v2465_v18 }
  0xe7   : > { %1585 = vmatpush3.bf16.msra.mxu1 %v2322_v20  ;;  %1685 = vmatpush3.bf16.msra.mxu0 %v2294_v7  ;;  %v395_v21 = vand.u32 4294901760, %v2471_v46  ;;  %v405_v0 = vand.u32 4294901760, %v2474_v24 }
  0xe8   : > { %1587 = vmatprep.subr.bf16.mxu1 %v2334_v25  ;;  %1687 = vmatprep.subr.bf16.mxu0 %v2297_v9 }
  0xe9   : > { %1467 = vmatprep.mubr.f32.mxu0 %v395_v21  ;;  %v396_v1 = vsub.f32 %v2471_v46, %v395_v21  ;;  %v406_v30 = vsub.f32 %v2474_v24, %v405_v0 }
  0xea   : > { %1468 = vmatmul.mubr.f32.gmra.mrb[2].mxu0 %v405_v0 }
  0xeb   : > { %1589 = vmatpush3.bf16.msra.mxu1 %v2334_v25  ;;  %1689 = vmatpush3.bf16.msra.mxu0 %v2297_v9  ;;  %v397_v20 = vand.u32 4294901760, %v396_v1  ;;  %v407_v7 = vand.u32 4294901760, %v406_v30 }
  0xec   : > { %1502 = vmatprep.mubr.f32.mxu0 %v2442_v61  ;;  %1591 = vmatprep.subr.bf16.mxu1 %v2352_v49 }
  0xed   : > { %1353 = vmatprep.mubr.f32.mxu1 %v397_v20  ;;  %1691 = vmatprep.subr.bf16.mxu0 %v2354_v50 }
  0xee   : > { %1354 = vmatmul.mubr.f32.gmra.mrb[2].mxu1 %v407_v7 }
  0xef   : > { %1593 = vmatpush3.bf16.msra.mxu1 %v2352_v49  ;;  %1693 = vmatpush3.bf16.msra.mxu0 %v2354_v50 }
  0xf0   : > { %1388 = vmatprep.mubr.f32.mxu1 %v2442_v61  ;;  %1595 = vmatprep.subr.bf16.mxu1 %v2373_v11 }
  0xf1   : > { %1695 = vmatprep.subr.bf16.mxu0 %v2358_v59 }
  0xf3   : > { %1597 = vmatpush3.bf16.msra.mxu1 %v2373_v11  ;;  %1697 = vmatpush3.bf16.msra.mxu0 %v2358_v59 }
  0xf4   : > { %1599 = vmatprep.subr.bf16.mxu1 %v2375_v12  ;;  %1699 = vmatprep.subr.bf16.mxu0 %v2370_v4 }
  0xf7   : > { %1601 = vmatpush3.bf16.msra.mxu1 %v2375_v12  ;;  %1701 = vmatpush3.bf16.msra.mxu0 %v2370_v4 }
  0xf8   : > { %1603 = vmatprep.subr.bf16.mxu1 %v2389_v26  ;;  %1703 = vmatprep.subr.bf16.mxu0 %v2383_v28 }
  0xfb   : > { %1605 = vmatpush3.bf16.msra.mxu1 %v2389_v26  ;;  %1705 = vmatpush3.bf16.msra.mxu0 %v2383_v28 }
  0xfc   : > { %1607 = vmatprep.subr.bf16.mxu1 %v2393_v51  ;;  %1707 = vmatprep.subr.bf16.mxu0 %v2195_v22 }
  0xfe   : > { %1503 = vmatmul.mubr.f32.vlgmr.msra.gmra.mrb[0].mxu0 %v2440_v60 }
  0xff   : > { %1609 = vmatpush3.bf16.msra.mxu1 %v2393_v51  ;;  %1505 = vmatprep.mubr.f32.mxu0 %v2463_v17 }
 0x100   : > { %1709 = vmatpush3.bf16.msra.mxu0 %v2195_v22  ;;  %1611 = vmatprep.subr.bf16.mxu1 %v2405_v10 }
 0x101   : > { %1711 = vmatprep.subr.bf16.mxu0 %v2201_v27 }
 0x102   : > { %1389 = vmatmul.mubr.f32.vlgmr.msra.gmra.mrb[0].mxu1 %v2440_v60  ;;  %1506 = vmatmul.mubr.f32.gmra.mrb[2].mxu0 %v2465_v18 }
 0x103   : > { %1391 = vmatprep.mubr.f32.mxu1 %v2463_v17  ;;  %1613 = vmatpush3.bf16.msra.mxu1 %v2405_v10 }
 0x104   : > { %1713 = vmatpush3.bf16.msra.mxu0 %v2201_v27  ;;  %1540 = vmatprep.mubr.f32.mxu0 %v2442_v61 }
 0x105   : > { %1615 = vmatprep.subr.bf16.mxu1 %v2409_v33  ;;  %1715 = vmatprep.subr.bf16.mxu0 %v2220_v38 }
 0x106   : > { %1392 = vmatmul.mubr.f32.gmra.mrb[2].mxu1 %v2465_v18 }
 0x107   : > { %1617 = vmatpush3.bf16.msra.mxu1 %v2409_v33  ;;  %1426 = vmatprep.mubr.f32.mxu1 %v2448_v63 }
 0x108   : > { %1717 = vmatpush3.bf16.msra.mxu0 %v2220_v38  ;;  %1619 = vmatprep.subr.bf16.mxu1 %v2413_v35 }
 0x109   : > { %1719 = vmatprep.subr.bf16.mxu0 %v2224_v39 }
 0x10b   : > { %1621 = vmatpush3.bf16.msra.mxu1 %v2413_v35 }
 0x10c   : > { %1721 = vmatpush3.bf16.msra.mxu0 %v2224_v39  ;;  %1623 = vmatprep.subr.bf16.mxu1 %v2417_v57 }
 0x10d   : > { %1723 = vmatprep.subr.bf16.mxu0 %v2236_v43 }
 0x10f   : > { %1625 = vmatpush3.bf16.msra.mxu1 %v2417_v57 }
 0x110   : > { %1725 = vmatpush3.bf16.msra.mxu0 %v2236_v43  ;;  %1627 = vmatprep.subr.bf16.mxu1 %v2421_v32 }
 0x111   : > { %1727 = vmatprep.subr.bf16.mxu0 %v2242_v44 }
 0x113   : > { %1629 = vmatpush3.bf16.msra.mxu1 %v2421_v32 }
 0x114   : > { %1729 = vmatpush3.bf16.msra.mxu0 %v2242_v44  ;;  %1631 = vmatprep.subr.bf16.mxu1 %v2425_v15 }
 0x115   : > { %1731 = vmatprep.subr.bf16.mxu0 %v2274_v56 }
 0x117   : > { %1633 = vmatpush3.bf16.msra.mxu1 %v2425_v15 }
 0x118   : > { %1733 = vmatpush3.bf16.msra.mxu0 %v2274_v56  ;;  %1635 = vmatprep.subr.bf16.mxu1 %v2428_v42 }
 0x119   : > { %1735 = vmatprep.subr.bf16.mxu0 %v2381_v19 }
 0x11b   : > { %1637 = vmatpush3.bf16.msra.mxu1 %v2428_v42 }
 0x11c   : > { %1737 = vmatpush3.bf16.msra.mxu0 %v2381_v19  ;;  %1639 = vmatprep.subr.bf16.mxu1 %v2430_v45 }
 0x11f   : > { %1541 = vmatmul.mubr.f32.vlgmr.msra.gmra.mrb[0].mxu0 %v2440_v60  ;;  %1641 = vmatpush3.bf16.msra.mxu1 %v2430_v45 }
 0x120   : > { %1543 = vmatprep.mubr.f32.mxu0 %v2463_v17 }
 0x122   : > { %1427 = vmatmul.mubr.f32.vlgmr.msra.gmra.mrb[0].mxu1 %v2445_v62 }
 0x123   : > { %1544 = vmatmul.mubr.f32.gmra.mrb[2].mxu0 %v2465_v18  ;;  %1429 = vmatprep.mubr.f32.mxu1 %v2471_v46 }
 0x126   : > { %1430 = vmatmul.mubr.f32.gmra.mrb[2].mxu1 %v2474_v24 }
 0x1f2   : > { %v1542_v22 = vpop.f32.mrb[0].mxu0 }
 0x1f3   : > { %v1040_v27 = vpop.f32.mrb[1].mxu0 }
 0x1f5   : > { %v1428_v38 = vpop.f32.mrb[0].mxu1 }
 0x1f6   : > { %v1738_v39 = vadd.f32 %v1542_v22, %v1428_v38  ;;  %v1545_v43 = vpop.f32.mrb[2].mxu0  ;;  %v682_v44 = vpop.f32.mrb[1].mxu1 }
 0x1f7   : > { %v1739_v56 = vadd.f32 %v1040_v27, %v682_v44  ;;  %v1052_v9 = vpop.f32.mrb[3].mxu0 }
 0x1f8   : > { %1063 = vst [vmem:[%s194_s7 + $0x8] sm:$0xff] %v1738_v39 }
 0x1f9   : > { %1062 = vst [vmem:[%s194_s7] sm:$0xff] %v1739_v56  ;;  %v1431_v25 = vpop.f32.mrb[2].mxu1 }
 0x1fa   : > { %v1740_v49 = vadd.f32 %v1545_v43, %v1431_v25  ;;  %v696_v50 = vpop.f32.mrb[3].mxu1 }
 0x1fb   : > { %v1741_v59 = vadd.f32 %v1052_v9, %v696_v50 }
 0x1fc   : > { %1065 = vst [vmem:[%s194_s7 + $0x18] sm:$0xff] %v1740_v49 }
 0x1fd   : > { %1064 = vst [vmem:[%s194_s7 + $0x10] sm:$0xff] %v1741_v59 }
 0x1fe   : > { %1909 = shalt.err (!%p1906_p5)
}
 0x1ff   : > { %s1910_s27 = scalar_lea.hbm %s2559_s30, 512  ;;  %s1914_s21 = scalar_lea.hbm %s2610_s2, 1024 }
 0x200   : > { %p1911_p9 = scmp.ne.s32.totalorder %s2559_s30, %s1910_s27  ;;  %p1915_p3 = scmp.lt.u32.totalorder %s2559_s30, %s2610_s2 }
 0x201   : > { %p1916_p7 = scmp.lt.u32.totalorder %s1914_s21, %s1910_s27  ;;  %p1918_p4 = scmp.lt.u32.totalorder %s1910_s27, %s2559_s30 }
 0x202   : > { %p1912_p1 = pnand %p1911_p9, %p2108_p10 }
 0x203   : > { %p1917_p13 = por %p1916_p7, %p1915_p3 }
 0x204   : > { %p1913_p2 = pneg %p1912_p1 }
 0x205   : > { %p1919_p6 = por %p1918_p4, %p1917_p13 }
 0x207   : > { %p1920_p8 = pnand %p1919_p6, %p1913_p2 }
 0x209   : > { %1923 = shalt.err (!%p1920_p8)
}
 0x20a   : > { %s1992_s19 = smov 128   ;;  %s1993_s7 = smov 8  }
 0x20b   : > { %1764 = dma.vmem_to_hbm [thread:$0]  (%p2108_p10), %s2554_s4, 512, %s2559_s30, %s1067_s23, %s1992_s19, %s1992_s19, %s1993_s7  }
 0x20c PF: > { %s1097_s5 = sand.u32 1, %s1962_s9   ;;  %p2628_p12 = scmp.ne.s32.totalorder %s2618_s20, 0 }
 0x20d   : > { %p2629_p11 = scmp.ge.s32.totalorder %s1982_s14, 2  ;;  %s1098_s8 = scalar_lea.sflag [#allocation4], %s1097_s5 }
 0x20f   : > { %p1775_p0 = pnand %p2629_p11, %p2628_p12 }
 0x211   : > { %1957 = dma.done.wait (!%p1775_p0), %s1098_s8, 512  }
 0x212   : > { %1959 = vsyncadd (!%p1775_p0), %s1098_s8, 4294966784  ;;  %s19_s14 = sadd.s32 1, %s1982_s14   ;;  %s2630_s9 = smov %s1966_s10 }
 0x213   : > { %p16_p5 = scmp.ge.s32.totalorder %s19_s14, 4   ;;  %s2631_s10 = smov %s1970_s11 }
 0x214   : > { %s2632_s11 = smov %s2117_s28  ;;  %s2633_s12 = smov %s1978_s13 }
 0x215   : > { %s2634_s13 = smov %s2636_s25  ;;  %18 = sbr.rel (!%p16_p5) target bundleno = 7 (0x7), region = 77 }
 0x21c   :  { %1103 = vsyncpa [#allocation3], 1 }
 0x21d   :  { %1105 = vsyncpa [#allocation3 + $0x1], 1 }
 0x21e   :  { %1106 = vsyncpa [#allocation6], 1 }
 0x21f   :  { %1107 = vsyncpa [#allocation4], 1 }
 0x220   :  { %1109 = vsyncpa [#allocation4 + $0x1], 1 }

</bundles_post_ra>
